<compile_context>
chip_gen: v7x
topology: tpu7x:2x2x1
jax: 0.10.0
libtpu: 0.0.40
codegen_flags: <defaults>
</compile_context>

<pallas_src>
import functools

import jax
import jax.numpy as jnp
from jax.experimental import pallas as pl
from jax.experimental.pallas import tpu as pltpu

LANE = 128  # TPU lane width


def _pad8(n):
    return ((n + 7) // 8) * 8


# ----------------------------------------------------------------------------
# Fused forward kernel
# ----------------------------------------------------------------------------
def _fused_forward_kernel(
    goal_ref, enc_ref, w_ref, b_ref,   # inputs
    pred_ref, obs_ref,                 # outputs (obs_ref is a VMEM scratch when obs is not returned)
    *, B, T, G, Sp, enc_k,
):
    f32 = jnp.float32
    bf16 = jnp.bfloat16
    S = G + T
    BT = B * T

    # Static offsets into the packed weight slab (all 8-row aligned).
    o_goal = 0
    o_enc = o_goal + 512
    o_f1 = o_enc + _pad8(enc_k)
    o_f2 = o_f1 + 256

    # Static lane offsets into the packed bias slab (all 128-lane aligned).
    gb = b_ref[:, 0:256]
    eb = b_ref[:, 256:512]
    f1b = b_ref[:, 512:640]
    f2b = b_ref[:, 640:768]

    # goal_emb = self.linear(goal_imgs)   -- nn.Linear(512, 256)
    goal_emb = (
        jnp.dot(goal_ref[...], w_ref[o_goal:o_goal + 512, :],
                preferred_element_type=f32)
        + gb
    )

    # obs = self.obs_encoder({...})
    # TODO(synk): real obs_encoder is hydra-config-defined (e.g. ResNet); stand-in is a
    # per-camera flatten + Linear + ReLU producing 128 feats each -> 256 total.
    # Both cameras share one fused (K,256) weight push; diagonal blocks are extracted.
    enc_out = jnp.maximum(
        jnp.dot(enc_ref[...], w_ref[o_enc:o_enc + enc_k, :],
                preferred_element_type=f32)
        + eb,
        0.0,
    )
    feat_a = enc_out[0:BT, 0:LANE]            # agentview rows x agentview weight block
    feat_i = enc_out[BT:2 * BT, LANE:2 * LANE]  # in-hand rows x in-hand weight block

    # Assemble the (B*Sp, 256) token slab directly in the obs ref (VMEM-resident).
    # Replaces torch.cat([feat_a, feat_i], -1) and torch.cat((goal_emb, obs), dim=1).
    # Sp is a multiple of 8 -> every per-batch base is sublane-aligned; pad rows zeroed.
    obs_ref[...] = jnp.zeros_like(obs_ref)
    for b in range(B):  # B, T, G, Sp are static Python ints -> static slices
        base = b * Sp
        obs_ref[base:base + G, :] = goal_emb[b * G:(b + 1) * G, :]
        obs_ref[base + G:base + S, 0:LANE] = feat_a[b * T:(b + 1) * T, :]
        obs_ref[base + G:base + S, LANE:2 * LANE] = feat_i[b * T:(b + 1) * T, :]

    obs = obs_ref[...]

    # pred = self.model(obs, goal)
    # TODO(synk): real diffusion model is hydra-config-defined; stand-in token-wise MLP
    # 256 -> 128 -> action_dim (goal conditioning unused).  fc2 output is lane-padded
    # to 128 so the pred store is a full unmasked tile; wrapper slices the 7 action dims.
    h1 = jnp.maximum(
        jnp.dot(obs.astype(bf16), w_ref[o_f1:o_f1 + 256, 0:LANE],
                preferred_element_type=f32)
        + f1b,
        0.0,
    )
    pred_ref[...] = (
        jnp.dot(h1.astype(bf16), w_ref[o_f2:o_f2 + 128, 0:LANE],
                preferred_element_type=f32)
        + f2b
    )


# ----------------------------------------------------------------------------
# Deterministic parameter construction (synthetic; not a checkpoint load)
# ----------------------------------------------------------------------------
def _init_linear(key, fan_in, fan_out, dtype=jnp.float32):
    kw, kb = jax.random.split(key)
    bound = 1.0 / jnp.sqrt(fan_in)
    w = jax.random.uniform(kw, (fan_in, fan_out), dtype, -bound, bound)
    b = jax.random.uniform(kb, (fan_out,), dtype, -bound, bound)
    return w, b


def make_params(key, c, h, w, action_dim=7):
    keys = jax.random.split(key, 5)
    img_feat = c * h * w

    gw, gb = _init_linear(keys[0], 512, 256)          # DiffusionPolicy.linear
    eaw, eab = _init_linear(keys[1], img_feat, 128)   # encoder, agentview camera
    eiw, eib = _init_linear(keys[2], img_feat, 128)   # encoder, in-hand camera
    f1w, f1b = _init_linear(keys[3], 256, 128)        # diffusion-head fc1
    f2w, f2b = _init_linear(keys[4], 128, action_dim)  # diffusion-head fc2

    # Merge the two per-camera encoder weights along N -> one 256-wide MXU push.
    ew = jnp.concatenate([eaw, eiw], axis=1)          # (img_feat, 256)
    eb = jnp.concatenate([eab, eib], axis=0)          # (256,)

    # Lane-pad fc2 N: action_dim -> 128 (unmasked pred store; wrapper slices).
    f2w = jnp.pad(f2w, ((0, 0), (0, LANE - action_dim)))
    f2b = jnp.pad(f2b, ((0, LANE - action_dim),))

    def pad_k(m):   # pad K rows up to a multiple of 8 (sublane-aligned slab offsets)
        return jnp.pad(m, ((0, _pad8(m.shape[0]) - m.shape[0]), (0, 0)))

    def pad_n(m, n=2 * LANE):   # pad N up to the slab width (extra columns unused)
        return jnp.pad(m, ((0, 0), (0, n - m.shape[1])))

    # One packed bf16 weight slab: [goal | enc | fc1 | fc2] stacked along K.
    # Weights in bf16 halve the weight DMA and hit the bf16 MXU path on all gens
    # (v7x has no int MXU path; fp8 would be the next step there).
    w_slab = jnp.concatenate(
        [pad_k(gw), pad_k(ew), pad_k(pad_n(f1w)), pad_k(pad_n(f2w))], axis=0
    ).astype(jnp.bfloat16)

    # One packed f32 bias slab (1, 768): [goal(256) | enc(256) | fc1(128) | fc2(128)].
    b_slab = jnp.concatenate([gb, eb, f1b, f2b]).astype(jnp.float32).reshape(1, -1)

    return {
        "w_slab": w_slab,
        "b_slab": b_slab,
        "action_dim": action_dim,
        "enc_k": img_feat,
    }


# ----------------------------------------------------------------------------
# Forward pass (mirrors DiffusionPolicy.forward, visual_input=True, if_train=False)
# ----------------------------------------------------------------------------
def diffusion_policy_forward(params, inputs, goal, if_return_obs=False):
    agentview_image, in_hand_image, goal_imgs = inputs
    B, T, C, H, W = agentview_image.shape
    Bg, G, Dg = goal_imgs.shape
    assert Bg == B, (Bg, B)
    assert Dg == 512, Dg
    S = G + T
    Sp = _pad8(S)  # sublane-aligned per-batch token count (pad rows zeroed in-kernel)
    action_dim = params["action_dim"]
    enc_k = C * H * W
    assert params["enc_k"] == enc_k

    # Flatten + bf16 cast in the wrapper: halves the activation HBM->VMEM DMA bytes and
    # removes VPU cast work from the kernel (only MXU operands are bf16; math stays f32).
    agent_flat = agentview_image.reshape(B * T, enc_k).astype(jnp.bfloat16)
    inhand_flat = in_hand_image.reshape(B * T, enc_k).astype(jnp.bfloat16)
    enc_in = jnp.concatenate([agent_flat, inhand_flat], axis=0)  # (2*B*T, enc_k)
    goal_flat = goal_imgs.reshape(B * G, Dg).astype(jnp.bfloat16)

    w_slab = params["w_slab"]
    b_slab = params["b_slab"]

    def full_spec(shape):
        return pl.BlockSpec(shape, lambda i, _n=len(shape): (0,) * _n)

    kernel = functools.partial(
        _fused_forward_kernel, B=B, T=T, G=G, Sp=Sp, enc_k=enc_k
    )

    args = (goal_flat, enc_in, w_slab, b_slab)
    in_specs = [full_spec(a.shape) for a in args]
    pred_shape = (B * Sp, LANE)
    obs_shape = (B * Sp, 2 * LANE)

    if if_return_obs:
        out_shape = (jax.ShapeDtypeStruct(pred_shape, jnp.float32),
                     jax.ShapeDtypeStruct(obs_shape, jnp.float32))
        out_specs = (full_spec(pred_shape), full_spec(obs_shape))
        scratch_shapes = []
    else:
        # obs never consumed -> no obs output / HBM writeback; slab lives in scratch.
        out_shape = jax.ShapeDtypeStruct(pred_shape, jnp.float32)
        out_specs = full_spec(pred_shape)
        scratch_shapes = [pltpu.VMEM(obs_shape, jnp.float32)]

    outs = pl.pallas_call(
        kernel,
        out_shape=out_shape,
        grid=(1,),
        in_specs=in_specs,
        out_specs=out_specs,
        scratch_shapes=scratch_shapes,
        compiler_params=pltpu.CompilerParams(dimension_semantics=("arbitrary",)),
    )(*args)

    if if_return_obs:
        pred_pad, obs_pad = outs
        pred = pred_pad.reshape(B, Sp, LANE)[:, :S, :action_dim]
        obs = obs_pad.reshape(B, Sp, 2 * LANE)[:, :S, :]
        return pred, obs

    pred_pad = outs
    return pred_pad.reshape(B, Sp, LANE)[:, :S, :action_dim]


# ----------------------------------------------------------------------------
# Pure-JAX reference (same bf16 operand rounding) for a tolerance check
# ----------------------------------------------------------------------------
def _ref_forward(params, inputs):
    agentview_image, in_hand_image, goal_imgs = inputs
    B, T, C, H, W = agentview_image.shape
    G = goal_imgs.shape[1]
    enc_k = C * H * W
    action_dim = params["action_dim"]

    w = params["w_slab"].astype(jnp.float32)
    bsl = params["b_slab"][0]
    o_enc = 512
    o_f1 = o_enc + _pad8(enc_k)
    o_f2 = o_f1 + 256
    gw = w[0:512, :]
    ew = w[o_enc:o_enc + enc_k, :]
    f1w = w[o_f1:o_f1 + 256, 0:LANE]
    f2w = w[o_f2:o_f2 + 128, 0:LANE]
    gb, eb, f1b, f2b = bsl[0:256], bsl[256:512], bsl[512:640], bsl[640:768]

    def b2f(x):
        return x.astype(jnp.bfloat16).astype(jnp.float32)

    goal_flat = b2f(goal_imgs.reshape(B * G, 512))
    a = b2f(agentview_image.reshape(B * T, enc_k))
    i = b2f(in_hand_image.reshape(B * T, enc_k))

    goal_emb = goal_flat @ gw + gb
    feat_a = jnp.maximum(a @ ew[:, 0:LANE] + eb[0:LANE], 0.0)
    feat_i = jnp.maximum(i @ ew[:, LANE:2 * LANE] + eb[LANE:2 * LANE], 0.0)
    cam = jnp.concatenate([feat_a, feat_i], axis=-1).reshape(B, T, 2 * LANE)
    obs = jnp.concatenate([goal_emb.reshape(B, G, 2 * LANE), cam], axis=1)
    h1 = jnp.maximum(b2f(obs) @ f1w + f1b, 0.0)
    pred = b2f(h1) @ f2w + f2b
    return pred[..., :action_dim], obs


# ----------------------------------------------------------------------------
if __name__ == "__main__":
    key = jax.random.PRNGKey(0)
    kp, k1, k2, k3, kg = jax.random.split(key, 5)

    B, T, C, H, W = 2, 4, 3, 16, 16
    G = 1  # number of goal tokens

    params = make_params(kp, C, H, W, action_dim=7)

    agentview_image = jax.random.normal(k1, (B, T, C, H, W), jnp.float32)
    in_hand_image = jax.random.normal(k2, (B, T, C, H, W), jnp.float32)
    goal_imgs = jax.random.normal(k3, (B, G, 512), jnp.float32)
    goal = jax.random.normal(kg, (B, 32), jnp.float32)  # conditioning (unused in stand-in)

    inputs = (agentview_image, in_hand_image, goal_imgs)

    pred, obs = diffusion_policy_forward(params, inputs, goal, if_return_obs=True)
    jax.block_until_ready(pred)
    jax.block_until_ready(obs)

    pred_only = diffusion_policy_forward(params, inputs, goal, if_return_obs=False)
    jax.block_until_ready(pred_only)

    assert pred.shape == (B, G + T, 7), pred.shape
    assert obs.shape == (B, G + T, 256), obs.shape
    assert pred_only.shape == (B, G + T, 7), pred_only.shape
    assert pred.dtype == jnp.float32 and obs.dtype == jnp.float32

    # tolerance-asserted pure-JAX reference (guards bf16 packing / slab offsets)
    pred_ref, obs_ref = _ref_forward(params, inputs)
    assert bool(jnp.allclose(pred, pred_ref, rtol=2e-2, atol=2e-2))
    assert bool(jnp.allclose(obs, obs_ref, rtol=2e-2, atol=2e-2))
    assert bool(jnp.allclose(pred, pred_only, rtol=1e-6, atol=1e-6))

    print("KERNEL_OK")
</pallas_src>

<mosaic_0001>
module attributes {stable_mosaic.version = 11 : i64} {
  func.func @_fused_forward_kernel(%arg0: i32, %arg1: memref<2x512xbf16, #tpu.memory_space<vmem>>, %arg2: memref<16x768xbf16, #tpu.memory_space<vmem>>, %arg3: memref<1664x256xbf16, #tpu.memory_space<vmem>>, %arg4: memref<1x768xf32, #tpu.memory_space<vmem>>, %arg5: memref<16x128xf32, #tpu.memory_space<vmem>>, %arg6: memref<16x256xf32, #tpu.memory_space<vmem>>) attributes {dimension_semantics = [#tpu.dimension_semantics<arbitrary>], iteration_bounds = array<i64: 1>, scalar_prefetch = 0 : i64, scratch_operands = 0 : i64, tpu.core_type = #tpu.core_type<tc>, window_params = [{pipeline_mode = #tpu.pipeline_mode<synchronous>, transform_indices = @transform_0, window_bounds = array<i64: 2, 512>}, {pipeline_mode = #tpu.pipeline_mode<synchronous>, transform_indices = @transform_1, window_bounds = array<i64: 16, 768>}, {pipeline_mode = #tpu.pipeline_mode<synchronous>, transform_indices = @transform_2, window_bounds = array<i64: 1664, 256>}, {pipeline_mode = #tpu.pipeline_mode<synchronous>, transform_indices = @transform_3, window_bounds = array<i64: 1, 768>}, {pipeline_mode = #tpu.pipeline_mode<synchronous>, transform_indices = @transform_4, window_bounds = array<i64: 16, 128>}, {pipeline_mode = #tpu.pipeline_mode<synchronous>, transform_indices = @transform_5, window_bounds = array<i64: 16, 256>}]} {
    %c0 = arith.constant 0 : index
    %c0_0 = arith.constant 0 : index
    %0 = vector.load %arg4[%c0, %c0_0] : memref<1x768xf32, #tpu.memory_space<vmem>>, vector<1x256xf32>
    %c0_1 = arith.constant 0 : index
    %c256 = arith.constant 256 : index
    %1 = vector.load %arg4[%c0_1, %c256] : memref<1x768xf32, #tpu.memory_space<vmem>>, vector<1x256xf32>
    %c0_2 = arith.constant 0 : index
    %c512 = arith.constant 512 : index
    %2 = vector.load %arg4[%c0_2, %c512] : memref<1x768xf32, #tpu.memory_space<vmem>>, vector<1x128xf32>
    %c0_3 = arith.constant 0 : index
    %c640 = arith.constant 640 : index
    %3 = vector.load %arg4[%c0_3, %c640] : memref<1x768xf32, #tpu.memory_space<vmem>>, vector<1x128xf32>
    %c0_4 = arith.constant 0 : index
    %c0_5 = arith.constant 0 : index
    %4 = vector.load %arg1[%c0_4, %c0_5] : memref<2x512xbf16, #tpu.memory_space<vmem>>, vector<2x512xbf16>
    %c0_6 = arith.constant 0 : index
    %c0_7 = arith.constant 0 : index
    %5 = vector.load %arg3[%c0_6, %c0_7] : memref<1664x256xbf16, #tpu.memory_space<vmem>>, vector<512x256xbf16>
    %cst = arith.constant dense<0.000000e+00> : vector<2x256xf32>
    %6 = tpu.matmul %4, %5, %cst {dimension_numbers = #tpu.dot_dimension_numbers<[1], [0], [0], [1], [0, 0, 1, 1], [], []>} : vector<2x512xbf16>, vector<512x256xbf16>, vector<2x256xf32> -> vector<2x256xf32>
    %7 = vector.broadcast %0 : vector<1x256xf32> to vector<2x256xf32>
    %8 = arith.addf %6, %7 : vector<2x256xf32>
    %c0_8 = arith.constant 0 : index
    %c0_9 = arith.constant 0 : index
    %9 = vector.load %arg2[%c0_8, %c0_9] : memref<16x768xbf16, #tpu.memory_space<vmem>>, vector<16x768xbf16>
    %c512_10 = arith.constant 512 : index
    %c0_11 = arith.constant 0 : index
    %10 = vector.load %arg3[%c512_10, %c0_11] : memref<1664x256xbf16, #tpu.memory_space<vmem>>, vector<768x256xbf16>
    %cst_12 = arith.constant dense<0.000000e+00> : vector<16x256xf32>
    %11 = tpu.matmul %9, %10, %cst_12 {dimension_numbers = #tpu.dot_dimension_numbers<[1], [0], [0], [1], [0, 0, 1, 1], [], []>} : vector<16x768xbf16>, vector<768x256xbf16>, vector<16x256xf32> -> vector<16x256xf32>
    %12 = vector.broadcast %1 : vector<1x256xf32> to vector<16x256xf32>
    %13 = arith.addf %11, %12 : vector<16x256xf32>
    %cst_13 = arith.constant 0.000000e+00 : f32
    %14 = vector.broadcast %cst_13 : f32 to vector<16x256xf32>
    %15 = arith.maximumf %13, %14 : vector<16x256xf32>
    %16 = vector.extract_strided_slice %15 {offsets = [0, 0], sizes = [8, 128], strides = [1, 1]} : vector<16x256xf32> to vector<8x128xf32>
    %17 = vector.extract_strided_slice %15 {offsets = [8, 128], sizes = [8, 128], strides = [1, 1]} : vector<16x256xf32> to vector<8x128xf32>
    %cst_14 = arith.constant 0.000000e+00 : f32
    %18 = vector.broadcast %cst_14 : f32 to vector<16x256xf32>
    %c0_15 = arith.constant 0 : index
    %c0_16 = arith.constant 0 : index
    %19 = vector.load %arg6[%c0_15, %c0_16] : memref<16x256xf32, #tpu.memory_space<vmem>>, vector<16x256xf32>
    tpu.vector_store %arg6[%c0_15, %c0_16], %18 {strides = array<i32>} : memref<16x256xf32, #tpu.memory_space<vmem>>, vector<16x256xf32>,
    %20 = vector.extract_strided_slice %8 {offsets = [0, 0], sizes = [1, 256], strides = [1, 1]} : vector<2x256xf32> to vector<1x256xf32>
    %c0_17 = arith.constant 0 : index
    %c0_18 = arith.constant 0 : index
    %21 = vector.load %arg6[%c0_17, %c0_18] : memref<16x256xf32, #tpu.memory_space<vmem>>, vector<1x256xf32>
    tpu.vector_store %arg6[%c0_17, %c0_18], %20 {strides = array<i32>} : memref<16x256xf32, #tpu.memory_space<vmem>>, vector<1x256xf32>,
    %22 = vector.extract_strided_slice %16 {offsets = [0, 0], sizes = [4, 128], strides = [1, 1]} : vector<8x128xf32> to vector<4x128xf32>
    %c1 = arith.constant 1 : index
    %c0_19 = arith.constant 0 : index
    %23 = vector.load %arg6[%c1, %c0_19] : memref<16x256xf32, #tpu.memory_space<vmem>>, vector<4x128xf32>
    tpu.vector_store %arg6[%c1, %c0_19], %22 {strides = array<i32>} : memref<16x256xf32, #tpu.memory_space<vmem>>, vector<4x128xf32>,
    %24 = vector.extract_strided_slice %17 {offsets = [0, 0], sizes = [4, 128], strides = [1, 1]} : vector<8x128xf32> to vector<4x128xf32>
    %c1_20 = arith.constant 1 : index
    %c128 = arith.constant 128 : index
    %25 = vector.load %arg6[%c1_20, %c128] : memref<16x256xf32, #tpu.memory_space<vmem>>, vector<4x128xf32>
    tpu.vector_store %arg6[%c1_20, %c128], %24 {strides = array<i32>} : memref<16x256xf32, #tpu.memory_space<vmem>>, vector<4x128xf32>,
    %26 = vector.extract_strided_slice %8 {offsets = [1, 0], sizes = [1, 256], strides = [1, 1]} : vector<2x256xf32> to vector<1x256xf32>
    %c8 = arith.constant 8 : index
    %c0_21 = arith.constant 0 : index
    %27 = vector.load %arg6[%c8, %c0_21] : memref<16x256xf32, #tpu.memory_space<vmem>>, vector<1x256xf32>
    tpu.vector_store %arg6[%c8, %c0_21], %26 {strides = array<i32>} : memref<16x256xf32, #tpu.memory_space<vmem>>, vector<1x256xf32>,
    %28 = vector.extract_strided_slice %16 {offsets = [4, 0], sizes = [4, 128], strides = [1, 1]} : vector<8x128xf32> to vector<4x128xf32>
    %c9 = arith.constant 9 : index
    %c0_22 = arith.constant 0 : index
    %29 = vector.load %arg6[%c9, %c0_22] : memref<16x256xf32, #tpu.memory_space<vmem>>, vector<4x128xf32>
    tpu.vector_store %arg6[%c9, %c0_22], %28 {strides = array<i32>} : memref<16x256xf32, #tpu.memory_space<vmem>>, vector<4x128xf32>,
    %30 = vector.extract_strided_slice %17 {offsets = [4, 0], sizes = [4, 128], strides = [1, 1]} : vector<8x128xf32> to vector<4x128xf32>
    %c9_23 = arith.constant 9 : index
    %c128_24 = arith.constant 128 : index
    %31 = vector.load %arg6[%c9_23, %c128_24] : memref<16x256xf32, #tpu.memory_space<vmem>>, vector<4x128xf32>
    tpu.vector_store %arg6[%c9_23, %c128_24], %30 {strides = array<i32>} : memref<16x256xf32, #tpu.memory_space<vmem>>, vector<4x128xf32>,
    %c0_25 = arith.constant 0 : index
    %c0_26 = arith.constant 0 : index
    %32 = vector.load %arg6[%c0_25, %c0_26] : memref<16x256xf32, #tpu.memory_space<vmem>>, vector<16x256xf32>
    %33 = arith.truncf %32 : vector<16x256xf32> to vector<16x256xbf16>
    %c1280 = arith.constant 1280 : index
    %c0_27 = arith.constant 0 : index
    %34 = vector.load %arg3[%c1280, %c0_27] : memref<1664x256xbf16, #tpu.memory_space<vmem>>, vector<256x128xbf16>
    %cst_28 = arith.constant dense<0.000000e+00> : vector<16x128xf32>
    %35 = tpu.matmul %33, %34, %cst_28 {dimension_numbers = #tpu.dot_dimension_numbers<[1], [0], [0], [1], [0, 0, 1, 1], [], []>} : vector<16x256xbf16>, vector<256x128xbf16>, vector<16x128xf32> -> vector<16x128xf32>
    %36 = vector.broadcast %2 : vector<1x128xf32> to vector<16x128xf32>
    %37 = arith.addf %35, %36 : vector<16x128xf32>
    %cst_29 = arith.constant 0.000000e+00 : f32
    %38 = vector.broadcast %cst_29 : f32 to vector<16x128xf32>
    %39 = arith.maximumf %37, %38 : vector<16x128xf32>
    %40 = arith.truncf %39 : vector<16x128xf32> to vector<16x128xbf16>
    %c1536 = arith.constant 1536 : index
    %c0_30 = arith.constant 0 : index
    %41 = vector.load %arg3[%c1536, %c0_30] : memref<1664x256xbf16, #tpu.memory_space<vmem>>, vector<128x128xbf16>
    %cst_31 = arith.constant dense<0.000000e+00> : vector<16x128xf32>
    %42 = tpu.matmul %40, %41, %cst_31 {dimension_numbers = #tpu.dot_dimension_numbers<[1], [0], [0], [1], [0, 0, 1, 1], [], []>} : vector<16x128xbf16>, vector<128x128xbf16>, vector<16x128xf32> -> vector<16x128xf32>
    %43 = vector.broadcast %3 : vector<1x128xf32> to vector<16x128xf32>
    %44 = arith.addf %42, %43 : vector<16x128xf32>
    %c0_32 = arith.constant 0 : index
    %c0_33 = arith.constant 0 : index
    %45 = vector.load %arg5[%c0_32, %c0_33] : memref<16x128xf32, #tpu.memory_space<vmem>>, vector<16x128xf32>
    tpu.vector_store %arg5[%c0_32, %c0_33], %44 {strides = array<i32>} : memref<16x128xf32, #tpu.memory_space<vmem>>, vector<16x128xf32>,
    return
  }
  func.func @transform_0(%arg0: i32) -> (i32, i32) {
    %c0_i32 = arith.constant 0 : i32
    %c0_i32_0 = arith.constant 0 : i32
    %c0_i32_1 = arith.constant 0 : i32
    return %c0_i32, %c0_i32_0 : i32, i32
  }
  func.func @transform_1(%arg0: i32) -> (i32, i32) {
    %c0_i32 = arith.constant 0 : i32
    %c0_i32_0 = arith.constant 0 : i32
    %c0_i32_1 = arith.constant 0 : i32
    return %c0_i32, %c0_i32_0 : i32, i32
  }
  func.func @transform_2(%arg0: i32) -> (i32, i32) {
    %c0_i32 = arith.constant 0 : i32
    %c0_i32_0 = arith.constant 0 : i32
    %c0_i32_1 = arith.constant 0 : i32
    return %c0_i32, %c0_i32_0 : i32, i32
  }
  func.func @transform_3(%arg0: i32) -> (i32, i32) {
    %c0_i32 = arith.constant 0 : i32
    %c0_i32_0 = arith.constant 0 : i32
    %c0_i32_1 = arith.constant 0 : i32
    return %c0_i32, %c0_i32_0 : i32, i32
  }
  func.func @transform_4(%arg0: i32) -> (i32, i32) {
    %c0_i32 = arith.constant 0 : i32
    %c0_i32_0 = arith.constant 0 : i32
    %c0_i32_1 = arith.constant 0 : i32
    return %c0_i32, %c0_i32_0 : i32, i32
  }
  func.func @transform_5(%arg0: i32) -> (i32, i32) {
    %c0_i32 = arith.constant 0 : i32
    %c0_i32_0 = arith.constant 0 : i32
    %c0_i32_1 = arith.constant 0 : i32
    return %c0_i32, %c0_i32_0 : i32, i32
  }
}

</mosaic_0001>

<bundles_post_ra>
// kernel: tpu_custom_call.1
= control target key start
LH: loop header
LB: loop body
LE: loop exit
PB: predicated region body
PF: predicated region fallthrough
CT: control target
= control target key end

     0   :  { %11 = vsyncpa [#allocation3], 0  ;;  %s2524_s0 = inlined_call_operand.hbm [shape: bf16[2,512], index: 0, kind: input, shape index: {}]   ;;  %s2525_s1 = inlined_call_operand.hbm [shape: bf16[16,768], index: 1, kind: input, shape index: {}]   ;;  %s2526_s2 = inlined_call_operand.hbm [shape: bf16[1664,256], index: 2, kind: input, shape index: {}]   ;;  %s2527_s3 = inlined_call_operand.vmem [shape: f32[1,768], index: 3, kind: input, shape index: {}]   ;;  %s2528_s4 = inlined_call_operand.hbm [shape: f32[16,128], index: 4, kind: output, shape index: {0}]   ;;  %s2529_s5 = inlined_call_operand.hbm [shape: f32[16,256], index: 5, kind: output, shape index: {1}]  }
   0x1   :  { %12 = vsyncpa [#allocation6], 0 }
   0x2   :  { %13 = vsyncpa [#allocation4], 0 }
   0x3   :  { %14 = vsyncpa [#allocation10], 0  ;;  %s2370_s18 = smov [#allocation5]   ;;  %s2252_s22 = scalar_lea.hbm %s2525_s1, 768 }
   0x4   :  { %s30_s19 = sshll.u32 %s2370_s18, 4  ;;  %p2253_p0 = scmp.ne.s32.totalorder %s2525_s1, %s2252_s22  ;;  %s31_s19 = int_to_ptr.vmem [resolvable:$true] %s30_s19 }
   0x5   :  { %p2256_p1 = scmp.lt.u32.totalorder %s2252_s22, %s2525_s1 }
   0x7   :  { %p2258_p2 = pnand %p2256_p1, %p2253_p0 }
   0x9   :  { %2261 = shalt.err (!%p2258_p2)
}
   0xa   :  { %s2262_s27 = scalar_lea.vmem %s31_s19, 768  ;;  %p2267_p4 = scmp.lt.s32.totalorder %s31_s19, %s31_s19 }
   0xb   :  { %p2263_p3 = scmp.ne.s32.totalorder %s31_s19, %s2262_s27  ;;  %p2268_p5 = scmp.lt.s32.totalorder %s2262_s27, %s2262_s27 }
   0xd   :  { %p2269_p6 = por %p2268_p5, %p2267_p4 }
   0xf   :  { %p2270_p7 = pnand %p2269_p6, %p2263_p3 }
  0x11   :  { %2273 = shalt.err (!%p2270_p7)
}
  0x12   :  { %s2371_s28 = smov 384   ;;  %s2372_s29 = smov 24  }
  0x13   :  { %36 = dma.hbm_to_vmem [thread:$0]  %s2525_s1, 768, %s31_s19, [#allocation6], %s2371_s28, %s2371_s28, %s2372_s29  }
  0x14   :  { %s2373_s7 = smov [#allocation2]   ;;  %s2374_s9 = smov [#allocation7]  }
  0x15   :  { %s21_s8 = sshll.u32 %s2373_s7, 4  ;;  %s42_s10 = sshll.u32 %s2374_s9, 4  ;;  %s22_s8 = int_to_ptr.vmem [resolvable:$true] %s21_s8  ;;  %s43_s10 = int_to_ptr.vmem [resolvable:$true] %s42_s10 }
  0x16   :  { %s2274_s13 = scalar_lea.hbm %s2524_s0, 64 }
  0x17   :  { %p2275_p8 = scmp.ne.s32.totalorder %s2524_s0, %s2274_s13  ;;  %p2278_p9 = scmp.lt.u32.totalorder %s2274_s13, %s2524_s0 }
  0x19   :  { %p2280_p10 = pnand %p2278_p9, %p2275_p8 }
  0x1b   :  { %2283 = shalt.err (!%p2280_p10)
}
  0x1c   :  { %s2284_s1 = scalar_lea.vmem %s22_s8, 64  ;;  %p2289_p12 = scmp.lt.s32.totalorder %s22_s8, %s22_s8 }
  0x1d   :  { %p2285_p11 = scmp.ne.s32.totalorder %s22_s8, %s2284_s1  ;;  %p2290_p13 = scmp.lt.s32.totalorder %s2284_s1, %s2284_s1 }
  0x1f   :  { %p2291_p0 = por %p2290_p13, %p2289_p12 }
  0x21   :  { %p2292_p1 = pnand %p2291_p0, %p2285_p11 }
  0x23   :  { %2295 = shalt.err (!%p2292_p1)
}
  0x24   :  { %24 = dma.hbm_to_vmem [thread:$0]  %s2524_s0, 64, %s22_s8, [#allocation3]  }
  0x25   :  { %s2296_s22 = scalar_lea.hbm %s2526_s2, 26624 }
  0x26   :  { %p2297_p2 = scmp.ne.s32.totalorder %s2526_s2, %s2296_s22  ;;  %p2300_p3 = scmp.lt.u32.totalorder %s2296_s22, %s2526_s2 }
  0x28   :  { %p2302_p4 = pnand %p2300_p3, %p2297_p2 }
  0x2a   :  { %2305 = shalt.err (!%p2302_p4)
}
  0x2b   :  { %s2306_s27 = scalar_lea.vmem %s43_s10, 26624  ;;  %p2311_p6 = scmp.lt.s32.totalorder %s43_s10, %s43_s10 }
  0x2c   :  { %p2307_p5 = scmp.ne.s32.totalorder %s43_s10, %s2306_s27  ;;  %p2312_p7 = scmp.lt.s32.totalorder %s2306_s27, %s2306_s27 }
  0x2e   :  { %p2313_p8 = por %p2312_p7, %p2311_p6 }
  0x30   :  { %p2314_p9 = pnand %p2313_p8, %p2307_p5 }
  0x32   :  { %2317 = shalt.err (!%p2314_p9)
}
  0x33   :  { %s2375_s0 = smov 128   ;;  %s2376_s28 = smov 8  }
  0x34   :  { %48 = dma.hbm_to_vmem [thread:$0]  %s2526_s2, 26624, %s43_s10, [#allocation6], %s2375_s0, %s2375_s0, %s2376_s28  }
  0x35   :  { %2362 = dma.done.wait [#allocation3], 64  }
  0x36   :  { %2363 = vsyncadd [#allocation3], 4294967232 }
  0x37   :  { %2364 = dma.done.wait [#allocation6], 27392  }
  0x38   :  { %2365 = vsyncadd [#allocation6], 4294939904  ;;  %v1979_v0 = vld [vmem:[#allocation7 + $0x4] ss:$8 sps:$4 sm:$0xff]   ;;  %v1983_v2 = vld [vmem:[#allocation7] ss:$8 sps:$4 sm:$0xff]   ;;  %v131_v38 = vlaneseq }
  0x39   :  { %v1981_v1 = vld [vmem:[#allocation7 + $0x204] ss:$8 sps:$4 sm:$0xff]   ;;  %490 = vmatprep.subr.bf16.mxu0 %v1979_v0  ;;  %v1984_v3 = vld [vmem:[#allocation7 + $0x200] ss:$8 sps:$4 sm:$0xff]   ;;  %v1985_v4 = vld [vmem:[#allocation7 + $0x14] ss:$8 sps:$4 sm:$0xff]  }
  0x3a   :  { %1195 = vmatprep.subr.bf16.mxu1 %v1981_v1  ;;  %491 = vmatpush1.bf16.msra.mxu0 %v1983_v2  ;;  %v1987_v5 = vld [vmem:[#allocation7 + $0x214] ss:$8 sps:$4 sm:$0xff]   ;;  %v1989_v6 = vld [vmem:[#allocation7 + $0x10] ss:$8 sps:$4 sm:$0xff]   ;;  %v1991_v8 = vld [vmem:[#allocation7 + $0x24] ss:$8 sps:$4 sm:$0xff]  }
  0x3b   :  { %1196 = vmatpush1.bf16.msra.mxu1 %v1984_v3  ;;  %492 = vmatprep.subr.bf16.mxu0 %v1985_v4  ;;  %v1990_v7 = vld [vmem:[#allocation7 + $0x210] ss:$8 sps:$4 sm:$0xff]   ;;  %v1993_v9 = vld [vmem:[#allocation7 + $0x224] ss:$8 sps:$4 sm:$0xff]   ;;  %v1995_v10 = vld [vmem:[#allocation7 + $0x20] ss:$8 sps:$4 sm:$0xff]  }
  0x3c   :  { %1197 = vmatprep.subr.bf16.mxu1 %v1987_v5  ;;  %v1996_v11 = vld [vmem:[#allocation7 + $0x220] ss:$8 sps:$4 sm:$0xff]   ;;  %v1997_v12 = vld [vmem:[#allocation7 + $0x34] ss:$8 sps:$4 sm:$0xff]   ;;  %v2001_v14 = vld [vmem:[#allocation7 + $0x30] ss:$8 sps:$4 sm:$0xff]  }
  0x3d   :  { %v1999_v13 = vld [vmem:[#allocation7 + $0x234] ss:$8 sps:$4 sm:$0xff]   ;;  %v2002_v15 = vld [vmem:[#allocation7 + $0x230] ss:$8 sps:$4 sm:$0xff]   ;;  %v2003_v16 = vld [vmem:[#allocation7 + $0x44] ss:$8 sps:$4 sm:$0xff]  }
  0x3e   :  { %493 = vmatpush1.bf16.msra.mxu0 %v1989_v6  ;;  %v2005_v17 = vld [vmem:[#allocation7 + $0x244] ss:$8 sps:$4 sm:$0xff]   ;;  %v2007_v18 = vld [vmem:[#allocation7 + $0x40] ss:$8 sps:$4 sm:$0xff]   ;;  %v2009_v20 = vld [vmem:[#allocation7 + $0x54] ss:$8 sps:$4 sm:$0xff]  }
  0x3f   :  { %1198 = vmatpush1.bf16.msra.mxu1 %v1990_v7  ;;  %494 = vmatprep.subr.bf16.mxu0 %v1991_v8  ;;  %v2008_v19 = vld [vmem:[#allocation7 + $0x240] ss:$8 sps:$4 sm:$0xff]   ;;  %v2011_v21 = vld [vmem:[#allocation7 + $0x254] ss:$8 sps:$4 sm:$0xff]   ;;  %v2013_v22 = vld [vmem:[#allocation7 + $0x50] ss:$8 sps:$4 sm:$0xff]  }
  0x40   :  { %1199 = vmatprep.subr.bf16.mxu1 %v1993_v9  ;;  %v2014_v23 = vld [vmem:[#allocation7 + $0x250] ss:$8 sps:$4 sm:$0xff]   ;;  %v2015_v24 = vld [vmem:[#allocation7 + $0x64] ss:$8 sps:$4 sm:$0xff]   ;;  %v2019_v26 = vld [vmem:[#allocation7 + $0x60] ss:$8 sps:$4 sm:$0xff]  }
  0x41   :  { %v2017_v25 = vld [vmem:[#allocation7 + $0x264] ss:$8 sps:$4 sm:$0xff]   ;;  %v2020_v27 = vld [vmem:[#allocation7 + $0x260] ss:$8 sps:$4 sm:$0xff]   ;;  %v2021_v28 = vld [vmem:[#allocation7 + $0x74] ss:$8 sps:$4 sm:$0xff]  }
  0x42   :  { %495 = vmatpush1.bf16.msra.mxu0 %v1995_v10  ;;  %v2023_v29 = vld [vmem:[#allocation7 + $0x274] ss:$8 sps:$4 sm:$0xff]   ;;  %v2025_v30 = vld [vmem:[#allocation7 + $0x70] ss:$8 sps:$4 sm:$0xff]   ;;  %v2027_v32 = vld [vmem:[#allocation7 + $0x84] ss:$8 sps:$4 sm:$0xff]  }
  0x43   :  { %1200 = vmatpush1.bf16.msra.mxu1 %v1996_v11  ;;  %496 = vmatprep.subr.bf16.mxu0 %v1997_v12  ;;  %v2026_v31 = vld [vmem:[#allocation7 + $0x270] ss:$8 sps:$4 sm:$0xff]   ;;  %v2029_v33 = vld [vmem:[#allocation7 + $0x284] ss:$8 sps:$4 sm:$0xff]   ;;  %v2031_v34 = vld [vmem:[#allocation7 + $0x80] ss:$8 sps:$4 sm:$0xff]  }
  0x44   :  { %1201 = vmatprep.subr.bf16.mxu1 %v1999_v13  ;;  %v2032_v35 = vld [vmem:[#allocation7 + $0x280] ss:$8 sps:$4 sm:$0xff]   ;;  %v2033_v36 = vld [vmem:[#allocation7 + $0x94] ss:$8 sps:$4 sm:$0xff]   ;;  %v2377_v39 = vmov 1966171168  }
  0x45   :  { %v2035_v37 = vld [vmem:[#allocation7 + $0x294] ss:$8 sps:$4 sm:$0xff]   ;;  %v151_v40 = vunpack.c.l.s4 %v2377_v39  ;;  %v2037_v41 = vld [vmem:[#allocation7 + $0x90] ss:$8 sps:$4 sm:$0xff]   ;;  %v2039_v43 = vld [vmem:[#allocation7 + $0xa4] ss:$8 sps:$4 sm:$0xff]  }
  0x46   :  { %497 = vmatpush1.bf16.msra.mxu0 %v2001_v14  ;;  %v2038_v42 = vld [vmem:[#allocation7 + $0x290] ss:$8 sps:$4 sm:$0xff]   ;;  %v2041_v44 = vld [vmem:[#allocation7 + $0x2a4] ss:$8 sps:$4 sm:$0xff]   ;;  %v2454_v45 = vshrl.u32 %v131_v38, 7  ;;  %vm1344_vm0 = vcmp.lt.s32.totalorder %v131_v38, 256 }
  0x47   :  { %1202 = vmatpush1.bf16.msra.mxu1 %v2002_v15  ;;  %498 = vmatprep.subr.bf16.mxu0 %v2003_v16  ;;  %v152_v46 = vunpack.c.0.s8 %v151_v40  ;;  %v2043_v47 = vld [vmem:[#allocation7 + $0xa0] ss:$8 sps:$4 sm:$0xff]   ;;  %v2045_v49 = vld [vmem:[#allocation7 + $0xb4] ss:$8 sps:$4 sm:$0xff]   ;;  %v2049_v51 = vld [vmem:[#allocation7 + $0xb0] ss:$8 sps:$4 sm:$0xff]  }
  0x48   :  { %1203 = vmatprep.subr.bf16.mxu1 %v2005_v17  ;;  %v2044_v48 = vld [vmem:[#allocation7 + $0x2a0] ss:$8 sps:$4 sm:$0xff]   ;;  %v2047_v50 = vld [vmem:[#allocation7 + $0x2b4] ss:$8 sps:$4 sm:$0xff]   ;;  %v2050_v54 = vld [vmem:[#allocation7 + $0x2b0] ss:$8 sps:$4 sm:$0xff]  }
  0x49   :  { %v2457_v52 = vsub.s32 %v152_v46, %v2454_v45  ;;  %v1705_v53 = vld.sshfl [vmem:[#allocation2] sm:$0x33 pattern:$0x75316420]  ;;  %v2055_v60 = vld [vmem:[#allocation7 + $0xc0] ss:$8 sps:$4 sm:$0xff]  }
  0x4a   :  { %499 = vmatpush1.bf16.msra.mxu0 %v2007_v18  ;;  %v2051_v55 = vld [vmem:[#allocation7 + $0xc4] ss:$8 sps:$4 sm:$0xff]   ;;  %v149_v56 = vcombine.high %v1705_v53, %v1705_v53  ;;  %v2056_v61 = vld [vmem:[#allocation7 + $0x2c0] ss:$8 sps:$4 sm:$0xff]   ;;  %v2057_v62 = vld [vmem:[#allocation7 + $0xd4] ss:$8 sps:$4 sm:$0xff]  }
  0x4b   :  { %1204 = vmatpush1.bf16.msra.mxu1 %v2008_v19  ;;  %500 = vmatprep.subr.bf16.mxu0 %v2009_v20  ;;  %v2053_v57 = vld [vmem:[#allocation7 + $0x2c4] ss:$8 sps:$4 sm:$0xff]   ;;  %v2059_v63 = vld [vmem:[#allocation7 + $0x2d4] ss:$8 sps:$4 sm:$0xff]   ;;  %v2061_v0 = vld [vmem:[#allocation7 + $0xd0] ss:$8 sps:$4 sm:$0xff]   ;;  %v2461_v14 = vrot.slane %v1705_v53, %v2457_v52 }
  0x4c   :  { %1205 = vmatprep.subr.bf16.mxu1 %v2011_v21  ;;  %v2080_v58 = vld [vmem:[#allocation5 + $0x4] ss:$24 sps:$4 sm:$0xff]   ;;  %v163_v59 = vrot.slane %v149_v56, %v2457_v52  ;;  %v2062_v1 = vld [vmem:[#allocation7 + $0x2d0] ss:$8 sps:$4 sm:$0xff]   ;;  %v2067_v4 = vld [vmem:[#allocation7 + $0xe0] ss:$8 sps:$4 sm:$0xff]  }
  0x4d   :  { %1227 = vmatprep.mubr.bf16.mxu1 %v2080_v58  ;;  %v2063_v2 = vld [vmem:[#allocation7 + $0xe4] ss:$8 sps:$4 sm:$0xff]   ;;  %v2068_v5 = vld [vmem:[#allocation7 + $0x2e0] ss:$8 sps:$4 sm:$0xff]   ;;  %v2069_v6 = vld [vmem:[#allocation7 + $0xf4] ss:$8 sps:$4 sm:$0xff]  }
  0x4e   :  { %501 = vmatpush1.bf16.msra.mxu0 %v2013_v22  ;;  %522 = vmatprep.mubr.bf16.mxu0 %v163_v59  ;;  %v2065_v3 = vld [vmem:[#allocation7 + $0x2e4] ss:$8 sps:$4 sm:$0xff]   ;;  %v2071_v7 = vld [vmem:[#allocation7 + $0x2f4] ss:$8 sps:$4 sm:$0xff]   ;;  %v2073_v8 = vld [vmem:[#allocation7 + $0xf0] ss:$8 sps:$4 sm:$0xff]   ;;  %v165_v18 = vcombine.high %v163_v59, %v163_v59 }
  0x4f   :  { %1206 = vmatpush1.bf16.msra.mxu1 %v2014_v23  ;;  %502 = vmatprep.subr.bf16.mxu0 %v2015_v24  ;;  %v2074_v9 = vld [vmem:[#allocation7 + $0x2f0] ss:$8 sps:$4 sm:$0xff]   ;;  %v2077_v10 = vld [vmem:[#allocation7 + $0x104] ss:$8 sps:$4 sm:$0xff]   ;;  %v2075_v12 = vld [vmem:[#allocation7 + $0x100] ss:$8 sps:$4 sm:$0xff]  }
  0x50   :  { %1207 = vmatprep.subr.bf16.mxu1 %v2017_v25  ;;  %v2083_v11 = vld [vmem:[#allocation7 + $0x304] ss:$8 sps:$4 sm:$0xff]   ;;  %v2078_v13 = vld [vmem:[#allocation5] ss:$24 sps:$4 sm:$0xff]   ;;  %v2086_v16 = vld [vmem:[#allocation7 + $0x114] ss:$8 sps:$4 sm:$0xff]  }
  0x51   :  { %v2081_v15 = vld [vmem:[#allocation7 + $0x300] ss:$8 sps:$4 sm:$0xff]   ;;  %v2089_v17 = vld [vmem:[#allocation7 + $0x314] ss:$8 sps:$4 sm:$0xff]   ;;  %v2084_v19 = vld [vmem:[#allocation7 + $0x110] ss:$8 sps:$4 sm:$0xff]  }
  0x52   :  { %503 = vmatpush1.bf16.msra.mxu0 %v2019_v26  ;;  %v2087_v20 = vld [vmem:[#allocation7 + $0x310] ss:$8 sps:$4 sm:$0xff]   ;;  %v2092_v21 = vld [vmem:[#allocation7 + $0x124] ss:$8 sps:$4 sm:$0xff]   ;;  %v2090_v23 = vld [vmem:[#allocation7 + $0x120] ss:$8 sps:$4 sm:$0xff]  }
  0x53   :  { %1208 = vmatpush1.bf16.msra.mxu1 %v2020_v27  ;;  %504 = vmatprep.subr.bf16.mxu0 %v2021_v28  ;;  %v2095_v22 = vld [vmem:[#allocation7 + $0x324] ss:$8 sps:$4 sm:$0xff]   ;;  %v2093_v24 = vld [vmem:[#allocation7 + $0x320] ss:$8 sps:$4 sm:$0xff]   ;;  %v2098_v25 = vld [vmem:[#allocation7 + $0x134] ss:$8 sps:$4 sm:$0xff]  }
  0x54   :  { %1209 = vmatprep.subr.bf16.mxu1 %v2023_v29  ;;  %v2101_v26 = vld [vmem:[#allocation7 + $0x334] ss:$8 sps:$4 sm:$0xff]   ;;  %v2096_v27 = vld [vmem:[#allocation7 + $0x130] ss:$8 sps:$4 sm:$0xff]   ;;  %v2104_v29 = vld [vmem:[#allocation7 + $0x144] ss:$8 sps:$4 sm:$0xff]  }
  0x55   :  { %v2099_v28 = vld [vmem:[#allocation7 + $0x330] ss:$8 sps:$4 sm:$0xff]   ;;  %v2119_v39 = vld [vmem:[#allocation7 + $0x364] ss:$8 sps:$4 sm:$0xff]   ;;  %v2114_v40 = vld [vmem:[#allocation7 + $0x160] ss:$8 sps:$4 sm:$0xff]  }
  0x56   :  { %505 = vmatpush1.bf16.msra.mxu0 %v2025_v30  ;;  %v2107_v30 = vld [vmem:[#allocation7 + $0x344] ss:$8 sps:$4 sm:$0xff]   ;;  %v2120_v46 = vld [vmem:[#allocation7 + $0x170] ss:$8 sps:$4 sm:$0xff]   ;;  %v2134_v53 = vld [vmem:[#allocation7 + $0x194] ss:$8 sps:$4 sm:$0xff]  }
  0x57   :  { %1210 = vmatpush1.bf16.msra.mxu1 %v2026_v31  ;;  %506 = vmatprep.subr.bf16.mxu0 %v2027_v32  ;;  %v2102_v31 = vld [vmem:[#allocation7 + $0x140] ss:$8 sps:$4 sm:$0xff]   ;;  %v2135_v56 = vld [vmem:[#allocation7 + $0x390] ss:$8 sps:$4 sm:$0xff]   ;;  %v2143_v58 = vld [vmem:[#allocation7 + $0x3a4] ss:$8 sps:$4 sm:$0xff]  }
  0x58   :  { %1211 = vmatprep.subr.bf16.mxu1 %v2029_v33  ;;  %v2105_v32 = vld [vmem:[#allocation7 + $0x340] ss:$8 sps:$4 sm:$0xff]   ;;  %v2110_v33 = vld [vmem:[#allocation7 + $0x154] ss:$8 sps:$4 sm:$0xff]   ;;  %vm2379_vm1 = vmmov 0   ;;  %s2380_s11 = smov [#allocation9]  }
  0x59   :  { %v2138_v59 = vld [vmem:[#allocation7 + $0x1a0] ss:$8 sps:$4 sm:$0xff]   ;;  %s1688_s12 = sshll.u32 %s2380_s11, 4  ;;  %s1689_s12 = int_to_ptr.vmem [resolvable:$true] %s1688_s12 }
  0x5a   :  { %507 = vmatpush1.bf16.msra.mxu0 %v2031_v34  ;;  %v2113_v34 = vld [vmem:[#allocation7 + $0x354] ss:$8 sps:$4 sm:$0xff]   ;;  %s2318_s13 = scalar_lea.vmem %s1689_s12, 512  ;;  %p2323_p11 = scmp.lt.s32.totalorder %s1689_s12, %s1689_s12 }
  0x5b   :  { %1212 = vmatpush1.bf16.msra.mxu1 %v2032_v35  ;;  %508 = vmatprep.subr.bf16.mxu0 %v2033_v36  ;;  %v2108_v35 = vld [vmem:[#allocation7 + $0x150] ss:$8 sps:$4 sm:$0xff]   ;;  %p2319_p10 = scmp.ne.s32.totalorder %s1689_s12, %s2318_s13  ;;  %p2324_p12 = scmp.lt.s32.totalorder %s2318_s13, %s2318_s13 }
  0x5c   :  { %1213 = vmatprep.subr.bf16.mxu1 %v2035_v37  ;;  %v2111_v36 = vld [vmem:[#allocation7 + $0x350] ss:$8 sps:$4 sm:$0xff]   ;;  %v2116_v37 = vld [vmem:[#allocation7 + $0x164] ss:$8 sps:$4 sm:$0xff]  }
  0x5d   :  { %p2325_p13 = por %p2324_p12, %p2323_p11 }
  0x5e   :  { %509 = vmatpush1.bf16.msra.mxu0 %v2037_v41  ;;  %v2117_v41 = vld [vmem:[#allocation7 + $0x360] ss:$8 sps:$4 sm:$0xff]  }
  0x5f   :  { %1214 = vmatpush1.bf16.msra.mxu1 %v2038_v42  ;;  %510 = vmatprep.subr.bf16.mxu0 %v2039_v43  ;;  %v2176_v42 = vld [vmem:[#allocation5 + $0xc] ss:$24 sps:$4 sm:$0xff]   ;;  %p2326_p0 = pnand %p2325_p13, %p2319_p10 }
  0x60   :  { %1215 = vmatprep.subr.bf16.mxu1 %v2041_v44  ;;  %v2122_v43 = vld [vmem:[#allocation7 + $0x174] ss:$8 sps:$4 sm:$0xff]  }
  0x61   :  { %v2125_v44 = vld [vmem:[#allocation7 + $0x374] ss:$8 sps:$4 sm:$0xff]  }
  0x62   :  { %511 = vmatpush1.bf16.msra.mxu0 %v2043_v47  ;;  %v2123_v47 = vld [vmem:[#allocation7 + $0x370] ss:$8 sps:$4 sm:$0xff]  }
  0x63   :  { %1216 = vmatpush1.bf16.msra.mxu1 %v2044_v48  ;;  %512 = vmatprep.subr.bf16.mxu0 %v2045_v49  ;;  %v2128_v48 = vld [vmem:[#allocation7 + $0x184] ss:$8 sps:$4 sm:$0xff]  }
  0x64   :  { %1217 = vmatprep.subr.bf16.mxu1 %v2047_v50  ;;  %v2131_v49 = vld [vmem:[#allocation7 + $0x384] ss:$8 sps:$4 sm:$0xff]   ;;  %v2126_v50 = vld [vmem:[#allocation7 + $0x180] ss:$8 sps:$4 sm:$0xff]  }
  0x66   :  { %513 = vmatpush1.bf16.msra.mxu0 %v2049_v51  ;;  %v2129_v51 = vld [vmem:[#allocation7 + $0x380] ss:$8 sps:$4 sm:$0xff]  }
  0x67   :  { %1218 = vmatpush1.bf16.msra.mxu1 %v2050_v54  ;;  %514 = vmatprep.subr.bf16.mxu0 %v2051_v55  ;;  %v2137_v54 = vld [vmem:[#allocation7 + $0x394] ss:$8 sps:$4 sm:$0xff]   ;;  %v2132_v55 = vld [vmem:[#allocation7 + $0x190] ss:$8 sps:$4 sm:$0xff]  }
  0x68   :  { %1219 = vmatprep.subr.bf16.mxu1 %v2053_v57  ;;  %v2140_v57 = vld [vmem:[#allocation7 + $0x1a4] ss:$8 sps:$4 sm:$0xff]  }
  0x6a   :  { %515 = vmatpush1.bf16.msra.mxu0 %v2055_v60  ;;  %v2141_v60 = vld [vmem:[#allocation7 + $0x3a0] ss:$8 sps:$4 sm:$0xff]  }
  0x6b   :  { %1220 = vmatpush1.bf16.msra.mxu1 %v2056_v61  ;;  %516 = vmatprep.subr.bf16.mxu0 %v2057_v62  ;;  %v2146_v61 = vld [vmem:[#allocation7 + $0x1b4] ss:$8 sps:$4 sm:$0xff]  }
  0x6c   :  { %1221 = vmatprep.subr.bf16.mxu1 %v2059_v63  ;;  %v2149_v62 = vld [vmem:[#allocation7 + $0x3b4] ss:$8 sps:$4 sm:$0xff]   ;;  %v2144_v63 = vld [vmem:[#allocation7 + $0x1b0] ss:$8 sps:$4 sm:$0xff]  }
  0x6e   :  { %517 = vmatpush1.bf16.msra.mxu0 %v2061_v0  ;;  %v2147_v0 = vld [vmem:[#allocation7 + $0x3b0] ss:$8 sps:$4 sm:$0xff]  }
  0x6f   :  { %1222 = vmatpush1.bf16.msra.mxu1 %v2062_v1  ;;  %518 = vmatprep.subr.bf16.mxu0 %v2063_v2  ;;  %v2152_v1 = vld [vmem:[#allocation7 + $0x1c4] ss:$8 sps:$4 sm:$0xff]  }
  0x70   :  { %1223 = vmatprep.subr.bf16.mxu1 %v2065_v3  ;;  %v2155_v2 = vld [vmem:[#allocation7 + $0x3c4] ss:$8 sps:$4 sm:$0xff]   ;;  %v2150_v3 = vld [vmem:[#allocation7 + $0x1c0] ss:$8 sps:$4 sm:$0xff]  }
  0x72   :  { %519 = vmatpush1.bf16.msra.mxu0 %v2067_v4  ;;  %v2153_v4 = vld [vmem:[#allocation7 + $0x3c0] ss:$8 sps:$4 sm:$0xff]  }
  0x73   :  { %1224 = vmatpush1.bf16.msra.mxu1 %v2068_v5  ;;  %520 = vmatprep.subr.bf16.mxu0 %v2069_v6  ;;  %v2158_v5 = vld [vmem:[#allocation7 + $0x1d4] ss:$8 sps:$4 sm:$0xff]  }
  0x74   :  { %1225 = vmatprep.subr.bf16.mxu1 %v2071_v7  ;;  %v2161_v6 = vld [vmem:[#allocation7 + $0x3d4] ss:$8 sps:$4 sm:$0xff]   ;;  %v2156_v7 = vld [vmem:[#allocation7 + $0x1d0] ss:$8 sps:$4 sm:$0xff]  }
  0x76   :  { %521 = vmatpush1.bf16.msra.mxu0 %v2073_v8  ;;  %v2159_v8 = vld [vmem:[#allocation7 + $0x3d0] ss:$8 sps:$4 sm:$0xff]  }
  0x77   :  { %1226 = vmatpush1.bf16.msra.mxu1 %v2074_v9  ;;  %531 = vmatprep.subr.bf16.mxu0 %v2077_v10  ;;  %v2164_v9 = vld [vmem:[#allocation7 + $0x1e4] ss:$8 sps:$4 sm:$0xff]  }
  0x78   :  { %1236 = vmatprep.subr.bf16.mxu1 %v2083_v11  ;;  %v2167_v10 = vld [vmem:[#allocation7 + $0x3e4] ss:$8 sps:$4 sm:$0xff]   ;;  %v2162_v11 = vld [vmem:[#allocation7 + $0x1e0] ss:$8 sps:$4 sm:$0xff]  }
  0x79   :  { %523 = vmatmul.mubr.bf16.vlgmr.msra.gmra.mrb[0].mxu0 %v2461_v14 }
  0x7a   :  { %1228 = vmatmul.mubr.bf16.vlgmr.msra.gmra.mrb[0].mxu1 %v2078_v13  ;;  %532 = vmatpush1.bf16.msra.mxu0 %v2075_v12  ;;  %v2165_v12 = vld [vmem:[#allocation7 + $0x3e0] ss:$8 sps:$4 sm:$0xff]   ;;  %v2170_v13 = vld [vmem:[#allocation7 + $0x1f4] ss:$8 sps:$4 sm:$0xff]  }
  0x7b   :  { %1237 = vmatpush1.bf16.msra.mxu1 %v2081_v15  ;;  %533 = vmatprep.subr.bf16.mxu0 %v2086_v16  ;;  %v2173_v15 = vld [vmem:[#allocation7 + $0x3f4] ss:$8 sps:$4 sm:$0xff]   ;;  %v2168_v16 = vld [vmem:[#allocation7 + $0x1f0] ss:$8 sps:$4 sm:$0xff]  }
  0x7c   :  { %1238 = vmatprep.subr.bf16.mxu1 %v2089_v17  ;;  %563 = vmatprep.mubr.bf16.mxu0 %v165_v18  ;;  %v2171_v17 = vld [vmem:[#allocation7 + $0x3f0] ss:$8 sps:$4 sm:$0xff]   ;;  %v2179_v18 = vld [vmem:[#allocation7 + $0x404] ss:$8 sps:$4 sm:$0xff]  }
  0x7d   :  { %1268 = vmatprep.mubr.bf16.mxu1 %v2176_v42  ;;  %v2207_v42 = vld [vmem:[#allocation7 + $0x4a0] ss:$8 sps:$4 sm:$0xff]  }
  0x7e   :  { %534 = vmatpush1.bf16.msra.mxu0 %v2084_v19  ;;  %v164_v19 = vcombine.high %v2461_v14, %v2461_v14  ;;  %v2186_v14 = vld [vmem:[#allocation7 + $0x430] ss:$8 sps:$4 sm:$0xff]  }
  0x7f   :  { %1239 = vmatpush1.bf16.msra.mxu1 %v2087_v20  ;;  %535 = vmatprep.subr.bf16.mxu0 %v2092_v21  ;;  %v2174_v20 = vld [vmem:[#allocation5 + $0x8] ss:$24 sps:$4 sm:$0xff]   ;;  %v2177_v21 = vld [vmem:[#allocation7 + $0x400] ss:$8 sps:$4 sm:$0xff]  }
  0x80   :  { %1240 = vmatprep.subr.bf16.mxu1 %v2095_v22  ;;  %v2227_v22 = vld [vmem:[#allocation5 + $0x14] ss:$24 sps:$4 sm:$0xff]  }
  0x82   :  { %536 = vmatpush1.bf16.msra.mxu0 %v2090_v23  ;;  %v2182_v23 = vld [vmem:[#allocation7 + $0x414] ss:$8 sps:$4 sm:$0xff]  }
  0x83   :  { %1241 = vmatpush1.bf16.msra.mxu1 %v2093_v24  ;;  %537 = vmatprep.subr.bf16.mxu0 %v2098_v25  ;;  %v2180_v24 = vld [vmem:[#allocation7 + $0x410] ss:$8 sps:$4 sm:$0xff]   ;;  %v2185_v25 = vld [vmem:[#allocation7 + $0x424] ss:$8 sps:$4 sm:$0xff]  }
  0x84   :  { %1242 = vmatprep.subr.bf16.mxu1 %v2101_v26  ;;  %v2183_v26 = vld [vmem:[#allocation7 + $0x420] ss:$8 sps:$4 sm:$0xff]  }
  0x86   :  { %538 = vmatpush1.bf16.msra.mxu0 %v2096_v27  ;;  %v2188_v27 = vld [vmem:[#allocation7 + $0x434] ss:$8 sps:$4 sm:$0xff]  }
  0x87   :  { %1243 = vmatpush1.bf16.msra.mxu1 %v2099_v28  ;;  %539 = vmatprep.subr.bf16.mxu0 %v2104_v29  ;;  %v2191_v28 = vld [vmem:[#allocation7 + $0x444] ss:$8 sps:$4 sm:$0xff]   ;;  %v2189_v29 = vld [vmem:[#allocation7 + $0x440] ss:$8 sps:$4 sm:$0xff]  }
  0x88   :  { %1244 = vmatprep.subr.bf16.mxu1 %v2107_v30  ;;  %v2194_v30 = vld [vmem:[#allocation7 + $0x454] ss:$8 sps:$4 sm:$0xff]  }
  0x8a   :  { %540 = vmatpush1.bf16.msra.mxu0 %v2102_v31  ;;  %v2192_v31 = vld [vmem:[#allocation7 + $0x450] ss:$8 sps:$4 sm:$0xff]  }
  0x8b   :  { %1245 = vmatpush1.bf16.msra.mxu1 %v2105_v32  ;;  %541 = vmatprep.subr.bf16.mxu0 %v2110_v33  ;;  %v2197_v32 = vld [vmem:[#allocation7 + $0x464] ss:$8 sps:$4 sm:$0xff]   ;;  %v2195_v33 = vld [vmem:[#allocation7 + $0x460] ss:$8 sps:$4 sm:$0xff]  }
  0x8c   :  { %1246 = vmatprep.subr.bf16.mxu1 %v2113_v34  ;;  %v2200_v34 = vld [vmem:[#allocation7 + $0x474] ss:$8 sps:$4 sm:$0xff]  }
  0x8e   :  { %542 = vmatpush1.bf16.msra.mxu0 %v2108_v35  ;;  %v2198_v35 = vld [vmem:[#allocation7 + $0x470] ss:$8 sps:$4 sm:$0xff]  }
  0x8f   :  { %1247 = vmatpush1.bf16.msra.mxu1 %v2111_v36  ;;  %543 = vmatprep.subr.bf16.mxu0 %v2116_v37  ;;  %v2203_v36 = vld [vmem:[#allocation7 + $0x484] ss:$8 sps:$4 sm:$0xff]   ;;  %v2201_v37 = vld [vmem:[#allocation7 + $0x480] ss:$8 sps:$4 sm:$0xff]  }
  0x90   :  { %1248 = vmatprep.subr.bf16.mxu1 %v2119_v39  ;;  %v2206_v39 = vld [vmem:[#allocation7 + $0x494] ss:$8 sps:$4 sm:$0xff]  }
  0x92   :  { %544 = vmatpush1.bf16.msra.mxu0 %v2114_v40  ;;  %v2204_v40 = vld [vmem:[#allocation7 + $0x490] ss:$8 sps:$4 sm:$0xff]  }
  0x93   :  { %1249 = vmatpush1.bf16.msra.mxu1 %v2117_v41  ;;  %545 = vmatprep.subr.bf16.mxu0 %v2122_v43  ;;  %v2209_v41 = vld [vmem:[#allocation7 + $0x4a4] ss:$8 sps:$4 sm:$0xff]   ;;  %v2212_v43 = vld [vmem:[#allocation7 + $0x4b4] ss:$8 sps:$4 sm:$0xff]  }
  0x94   :  { %1250 = vmatprep.subr.bf16.mxu1 %v2125_v44  ;;  %v2210_v44 = vld [vmem:[#allocation7 + $0x4b0] ss:$8 sps:$4 sm:$0xff]  }
  0x96   :  { %546 = vmatpush1.bf16.msra.mxu0 %v2120_v46  ;;  %v2215_v46 = vld [vmem:[#allocation7 + $0x4c4] ss:$8 sps:$4 sm:$0xff]  }
  0x97   :  { %1251 = vmatpush1.bf16.msra.mxu1 %v2123_v47  ;;  %547 = vmatprep.subr.bf16.mxu0 %v2128_v48  ;;  %v2213_v47 = vld [vmem:[#allocation7 + $0x4c0] ss:$8 sps:$4 sm:$0xff]   ;;  %v2218_v48 = vld [vmem:[#allocation7 + $0x4d4] ss:$8 sps:$4 sm:$0xff]  }
  0x98   :  { %1252 = vmatprep.subr.bf16.mxu1 %v2131_v49  ;;  %v2216_v49 = vld [vmem:[#allocation7 + $0x4d0] ss:$8 sps:$4 sm:$0xff]  }
  0x9a   :  { %548 = vmatpush1.bf16.msra.mxu0 %v2126_v50  ;;  %v2221_v50 = vld [vmem:[#allocation7 + $0x4e4] ss:$8 sps:$4 sm:$0xff]  }
  0x9b   :  { %1253 = vmatpush1.bf16.msra.mxu1 %v2129_v51  ;;  %549 = vmatprep.subr.bf16.mxu0 %v2134_v53  ;;  %v2219_v51 = vld [vmem:[#allocation7 + $0x4e0] ss:$8 sps:$4 sm:$0xff]   ;;  %v2224_v53 = vld [vmem:[#allocation7 + $0x4f4] ss:$8 sps:$4 sm:$0xff]  }
  0x9c   :  { %1254 = vmatprep.subr.bf16.mxu1 %v2137_v54  ;;  %v2222_v54 = vld [vmem:[#allocation7 + $0x4f0] ss:$8 sps:$4 sm:$0xff]  }
  0x9e   :  { %550 = vmatpush1.bf16.msra.mxu0 %v2132_v55  ;;  %v2225_v55 = vld [vmem:[#allocation5 + $0x10] ss:$24 sps:$4 sm:$0xff]  }
  0x9f   :  { %1255 = vmatpush1.bf16.msra.mxu1 %v2135_v56  ;;  %551 = vmatprep.subr.bf16.mxu0 %v2140_v57  ;;  %v2378_v56 = vmov 0.0   ;;  %v2228_v57 = vld [vmem:[#allocation7 + $0x580] ss:$8 sps:$4 sm:$0xff]  }
  0xa0   :  { %1256 = vmatprep.subr.bf16.mxu1 %v2143_v58  ;;  %1320 = vst [vmem:[#allocation9] sm:$0xff] %v2378_v56  ;;  %1322 = vst [vmem:[#allocation9 + $0x10] sm:$0xff] %v2378_v56  ;;  %v2229_v58 = vld [vmem:[#allocation7 + $0x500] ss:$8 sps:$4 sm:$0xff]  }
  0xa1   :  { %1321 = vst [vmem:[#allocation9 + $0x8] sm:$0xff] %v2378_v56  ;;  %1323 = vst [vmem:[#allocation9 + $0x18] sm:$0xff] %v2378_v56 }
  0xa2   :  { %552 = vmatpush1.bf16.msra.mxu0 %v2138_v59  ;;  %v2230_v59 = vld [vmem:[#allocation7 + $0x590] ss:$8 sps:$4 sm:$0xff]  }
  0xa3   :  { %1257 = vmatpush1.bf16.msra.mxu1 %v2141_v60  ;;  %553 = vmatprep.subr.bf16.mxu0 %v2146_v61  ;;  %v2231_v60 = vld [vmem:[#allocation7 + $0x510] ss:$8 sps:$4 sm:$0xff]   ;;  %v2232_v61 = vld [vmem:[#allocation7 + $0x5a0] ss:$8 sps:$4 sm:$0xff]  }
  0xa4   :  { %1258 = vmatprep.subr.bf16.mxu1 %v2149_v62  ;;  %v2233_v62 = vld [vmem:[#allocation7 + $0x520] ss:$8 sps:$4 sm:$0xff]  }
  0xa6   :  { %554 = vmatpush1.bf16.msra.mxu0 %v2144_v63  ;;  %v2234_v63 = vld [vmem:[#allocation7 + $0x5b0] ss:$8 sps:$4 sm:$0xff]  }
  0xa7   :  { %1259 = vmatpush1.bf16.msra.mxu1 %v2147_v0  ;;  %555 = vmatprep.subr.bf16.mxu0 %v2152_v1  ;;  %v2235_v0 = vld [vmem:[#allocation7 + $0x530] ss:$8 sps:$4 sm:$0xff]   ;;  %v2236_v1 = vld [vmem:[#allocation7 + $0x5c0] ss:$8 sps:$4 sm:$0xff]  }
  0xa8   :  { %1260 = vmatprep.subr.bf16.mxu1 %v2155_v2  ;;  %v2237_v2 = vld [vmem:[#allocation7 + $0x540] ss:$8 sps:$4 sm:$0xff]  }
  0xaa   :  { %556 = vmatpush1.bf16.msra.mxu0 %v2150_v3  ;;  %v2238_v3 = vld [vmem:[#allocation7 + $0x5d0] ss:$8 sps:$4 sm:$0xff]  }
  0xab   :  { %1261 = vmatpush1.bf16.msra.mxu1 %v2153_v4  ;;  %557 = vmatprep.subr.bf16.mxu0 %v2158_v5  ;;  %v2239_v4 = vld [vmem:[#allocation7 + $0x550] ss:$8 sps:$4 sm:$0xff]   ;;  %v2240_v5 = vld [vmem:[#allocation7 + $0x5e0] ss:$8 sps:$4 sm:$0xff]  }
  0xac   :  { %1262 = vmatprep.subr.bf16.mxu1 %v2161_v6  ;;  %v2241_v6 = vld [vmem:[#allocation7 + $0x560] ss:$8 sps:$4 sm:$0xff]  }
  0xae   :  { %558 = vmatpush1.bf16.msra.mxu0 %v2156_v7  ;;  %v2242_v7 = vld [vmem:[#allocation7 + $0x5f0] ss:$8 sps:$4 sm:$0xff]  }
  0xaf   :  { %1263 = vmatpush1.bf16.msra.mxu1 %v2159_v8  ;;  %559 = vmatprep.subr.bf16.mxu0 %v2164_v9  ;;  %v2243_v8 = vld [vmem:[#allocation7 + $0x570] ss:$8 sps:$4 sm:$0xff]   ;;  %v133_v9 = vsub.s32 0, %v2454_v45 }
  0xb0   :  { %1264 = vmatprep.subr.bf16.mxu1 %v2167_v10  ;;  %v61_v10 = vld [vmem:[%s2527_s3] sm:$0x3] }
  0xb2   :  { %560 = vmatpush1.bf16.msra.mxu0 %v2162_v11  ;;  %v137_v11 = vsub.s32 1, %v2454_v45  ;;  %v62_v45 = vld [vmem:[%s2527_s3 + $0x2] sm:$0x3] }
  0xb3   :  { %1265 = vmatpush1.bf16.msra.mxu1 %v2165_v12  ;;  %561 = vmatprep.subr.bf16.mxu0 %v2170_v13  ;;  %v134_v12 = vrot.slane %v61_v10, %v133_v9 }
  0xb4   :  { %1266 = vmatprep.subr.bf16.mxu1 %v2173_v15  ;;  %v138_v13 = vrot.slane %v61_v10, %v137_v11 }
  0xb6   :  { %562 = vmatpush1.bf16.msra.mxu0 %v2168_v16 }
  0xb7   :  { %1267 = vmatpush1.bf16.msra.mxu1 %v2171_v17  ;;  %1898 = vmatprep.subr.bf16.mxu0 %v2228_v57 }
  0xb8   :  { %1277 = vmatprep.subr.bf16.mxu1 %v2179_v18 }
  0xb9   :  { %564 = vmatmul.mubr.bf16.vlgmr.msra.gmra.mrb[0].mxu0 %v164_v19 }
  0xba   :  { %1269 = vmatmul.mubr.bf16.vlgmr.msra.gmra.mrb[0].mxu1 %v2174_v20  ;;  %1899 = vmatpush3.bf16.msra.mxu0 %v2229_v58 }
  0xbb   :  { %1278 = vmatpush1.bf16.msra.mxu1 %v2177_v21  ;;  %1309 = vmatprep.mubr.bf16.mxu1 %v2227_v22 }
  0xbc   :  { %1279 = vmatprep.subr.bf16.mxu1 %v2182_v23  ;;  %1900 = vmatprep.subr.bf16.mxu0 %v2230_v59 }
  0xbe   :  { %1901 = vmatpush3.bf16.msra.mxu0 %v2231_v60 }
  0xbf   :  { %1280 = vmatpush1.bf16.msra.mxu1 %v2180_v24  ;;  %1902 = vmatprep.subr.bf16.mxu0 %v2232_v61 }
  0xc0   :  { %1281 = vmatprep.subr.bf16.mxu1 %v2185_v25 }
  0xc2   :  { %1903 = vmatpush3.bf16.msra.mxu0 %v2233_v62 }
  0xc3   :  { %1282 = vmatpush1.bf16.msra.mxu1 %v2183_v26  ;;  %1904 = vmatprep.subr.bf16.mxu0 %v2234_v63  ;;  %v678_v26 = vrot.slane %v62_v45, %v133_v9 }
  0xc4   :  { %1283 = vmatprep.subr.bf16.mxu1 %v2188_v27 }
  0xc6   :  { %1905 = vmatpush3.bf16.msra.mxu0 %v2235_v0 }
  0xc7   :  { %1284 = vmatpush1.bf16.msra.mxu1 %v2186_v14  ;;  %1906 = vmatprep.subr.bf16.mxu0 %v2236_v1  ;;  %v682_v14 = vrot.slane %v62_v45, %v137_v11 }
  0xc8   :  { %1285 = vmatprep.subr.bf16.mxu1 %v2191_v28 }
  0xca   :  { %1907 = vmatpush3.bf16.msra.mxu0 %v2237_v2 }
  0xcb   :  { %1286 = vmatpush1.bf16.msra.mxu1 %v2189_v29  ;;  %1908 = vmatprep.subr.bf16.mxu0 %v2238_v3 }
  0xcc   :  { %1287 = vmatprep.subr.bf16.mxu1 %v2194_v30 }
  0xce   :  { %1909 = vmatpush3.bf16.msra.mxu0 %v2239_v4 }
  0xcf   :  { %1288 = vmatpush1.bf16.msra.mxu1 %v2192_v31  ;;  %1910 = vmatprep.subr.bf16.mxu0 %v2240_v5 }
  0xd0   :  { %1289 = vmatprep.subr.bf16.mxu1 %v2197_v32 }
  0xd2   :  { %1911 = vmatpush3.bf16.msra.mxu0 %v2241_v6 }
  0xd3   :  { %1290 = vmatpush1.bf16.msra.mxu1 %v2195_v33  ;;  %1912 = vmatprep.subr.bf16.mxu0 %v2242_v7 }
  0xd4   :  { %1291 = vmatprep.subr.bf16.mxu1 %v2200_v34 }
  0xd6   :  { %1913 = vmatpush3.bf16.msra.mxu0 %v2243_v8 }
  0xd7   :  { %1292 = vmatpush1.bf16.msra.mxu1 %v2198_v35  ;;  %1929 = vmatprep.subr.bf16.mxu0 %v2378_v56 }
  0xd8   :  { %1293 = vmatprep.subr.bf16.mxu1 %v2203_v36 }
  0xdb   :  { %1294 = vmatpush1.bf16.msra.mxu1 %v2201_v37 }
  0xdc   :  { %1295 = vmatprep.subr.bf16.mxu1 %v2206_v39 }
  0xdf   :  { %1296 = vmatpush1.bf16.msra.mxu1 %v2204_v40 }
  0xe0   :  { %1297 = vmatprep.subr.bf16.mxu1 %v2209_v41 }
  0xe3   :  { %1298 = vmatpush1.bf16.msra.mxu1 %v2207_v42 }
  0xe4   :  { %1299 = vmatprep.subr.bf16.mxu1 %v2212_v43  ;;  %v2244_v43 = vld [vmem:[#allocation7 + $0x600] ss:$8 sps:$4 sm:$0xff]  }
  0xe7   :  { %1300 = vmatpush1.bf16.msra.mxu1 %v2210_v44 }
  0xe8   :  { %1301 = vmatprep.subr.bf16.mxu1 %v2215_v46  ;;  %v2245_v46 = vld [vmem:[#allocation7 + $0x610] ss:$8 sps:$4 sm:$0xff]  }
  0xeb   :  { %1302 = vmatpush1.bf16.msra.mxu1 %v2213_v47  ;;  %v2246_v47 = vld [vmem:[#allocation7 + $0x620] ss:$8 sps:$4 sm:$0xff]  }
  0xec   :  { %1303 = vmatprep.subr.bf16.mxu1 %v2218_v48  ;;  %v2247_v48 = vld [vmem:[#allocation7 + $0x630] ss:$8 sps:$4 sm:$0xff]  }
  0xef   :  { %1304 = vmatpush1.bf16.msra.mxu1 %v2216_v49  ;;  %v2248_v49 = vld [vmem:[#allocation7 + $0x640] ss:$8 sps:$4 sm:$0xff]  }
  0xf0   :  { %1305 = vmatprep.subr.bf16.mxu1 %v2221_v50  ;;  %v2249_v50 = vld [vmem:[#allocation7 + $0x650] ss:$8 sps:$4 sm:$0xff]  }
  0xf3   :  { %1306 = vmatpush1.bf16.msra.mxu1 %v2219_v51  ;;  %v2250_v51 = vld [vmem:[#allocation7 + $0x660] ss:$8 sps:$4 sm:$0xff]  }
  0xf4   :  { %1307 = vmatprep.subr.bf16.mxu1 %v2224_v53  ;;  %v2251_v53 = vld [vmem:[#allocation7 + $0x670] ss:$8 sps:$4 sm:$0xff]  }
  0xf7   :  { %1308 = vmatpush1.bf16.msra.mxu1 %v2222_v54 }
  0xfa   :  { %1310 = vmatmul.mubr.bf16.vlgmr.msra.gmra.mrb[0].mxu1 %v2225_v55  ;;  %v1872_v55 = vld [vmem:[%s2527_s3 + $0x4] ss:$0 sm:$0xff] }
 0x18c   :  { %v565_v15 = vpop.f32.mrb[0].mxu0 }
 0x18d   :  { %v1949_v16 = vadd.f32 %v565_v15, %v134_v12  ;;  %v567_v17 = vpop.f32.mrb[1].mxu0 }
 0x18e   :  { %v1950_v18 = vadd.f32 %v567_v17, %v138_v13  ;;  %v569_v19 = vpop.f32.mrb[2].mxu0 }
 0x18f   :  { %v570_v20 = vpop.f32.mrb[3].mxu0 }
 0x190   :  { %v1326_v21 = vcombine.low %v1949_v16, %v1950_v18 }
 0x192   :  { %v1333_v22 = vrot.slane %v1326_v21, %v2457_v52 }
 0x194   :  { %v1340_v23 = vrot.slane %v1333_v22, %v2457_v52  ;;  %v1356_v24 = vcombine.high %v1333_v22, %v1333_v22 }
 0x196   :  { %v1363_v25 = vrot.slane %v1356_v24, %v2457_v52  ;;  %1346 = vst.msk [vmem:[#allocation9] ss:$8 sm:$0x3] %vm1344_vm0, %v1340_v23 }
 0x198   :  { %1366 = vst.msk [vmem:[#allocation9 + $0x10] ss:$8 sm:$0x3] %vm1344_vm0, %v1363_v25 }
 0x1cd   :  { %v1311_v27 = vpop.f32.mrb[0].mxu1 }
 0x1ce   :  { %v1951_v28 = vadd.f32 %v1311_v27, %v678_v26  ;;  %v1313_v29 = vpop.f32.mrb[1].mxu1 }
 0x1cf   :  { %v1314_v30 = vpop.f32.mrb[2].mxu1 }
 0x1d0   :  { %v1318_v31 = vmax.f32 %v1951_v28, 0.0  ;;  %v1315_v32 = vpop.f32.mrb[3].mxu1 }
 0x1d1   :  { %v1952_v38 = vadd.f32 %v1315_v32, %v682_v14 }
 0x1d2   :  { %v1349_v33 = vrot.slane %v1318_v31, 7  ;;  %v1368_v34 = vrot.slane %v1318_v31, 3 }
 0x1d3   :  { %v1319_v35 = vmax.f32 %v1952_v38, 0.0 }
 0x1d4   :  { %1351 = vst [vmem:[#allocation9] sm:$0x1e] %v1349_v33  ;;  %1370 = vst [vmem:[#allocation9 + $0x10] sm:$0x1e] %v1368_v34 }
 0x1d5   :  { %v1353_v52 = vrot.slane %v1319_v35, 7  ;;  %v1371_v36 = vrot.slane %v1319_v35, 3 }
 0x1d7   :  { %1355 = vst [vmem:[#allocation9 + $0x8] sm:$0x1e] %v1353_v52  ;;  %1373 = vst [vmem:[#allocation9 + $0x18] sm:$0x1e] %v1371_v36 }
 0x1db   :  { %v1374_v37 = vld [vmem:[#allocation9] sm:$0xff]  ;;  %v1376_v39 = vld [vmem:[#allocation9 + $0x10] sm:$0xff] }
 0x1dc   :  { %v1378_v44 = vpack.c.bf16 %v1376_v39, %v1374_v37 }
 0x1de   :  { %v1375_v40 = vld [vmem:[#allocation9 + $0x8] sm:$0xff]  ;;  %v1377_v41 = vld [vmem:[#allocation9 + $0x18] sm:$0xff] }
 0x1df   :  { %v1379_v42 = vpack.c.bf16 %v1377_v41, %v1375_v40 }
 0x1e1   :  { %1546 = vmatprep.mubr.bf16.mxu0 %v1379_v42 }
 0x1e2   :  { %1547 = vmatmul.mubr.bf16.vlgmr.msra.gmra.mrb[4].mxu0 %v1378_v44 }
 0x1e3   :  { %1930 = vmatpush3.bf16.msra.mxu0 %v2244_v43  ;;  %1945 = vmatprep.mubr.msk.bf16.mxu0 %vm2379_vm1, %v2378_v56 }
 0x1e4   :  { %1931 = vmatprep.subr.bf16.mxu0 %v2378_v56 }
 0x1e7   :  { %1932 = vmatpush3.bf16.msra.mxu0 %v2245_v46 }
 0x1e8   :  { %1933 = vmatprep.subr.bf16.mxu0 %v2378_v56 }
 0x1eb   :  { %1934 = vmatpush3.bf16.msra.mxu0 %v2246_v47 }
 0x1ec   :  { %1935 = vmatprep.subr.bf16.mxu0 %v2378_v56 }
 0x1ef   :  { %1936 = vmatpush3.bf16.msra.mxu0 %v2247_v48 }
 0x1f0   :  { %1937 = vmatprep.subr.bf16.mxu0 %v2378_v56 }
 0x1f3   :  { %1938 = vmatpush3.bf16.msra.mxu0 %v2248_v49 }
 0x1f4   :  { %1939 = vmatprep.subr.bf16.mxu0 %v2378_v56 }
 0x1f7   :  { %1940 = vmatpush3.bf16.msra.mxu0 %v2249_v50 }
 0x1f8   :  { %1941 = vmatprep.subr.bf16.mxu0 %v2378_v56 }
 0x1fb   :  { %1942 = vmatpush3.bf16.msra.mxu0 %v2250_v51 }
 0x1fc   :  { %1943 = vmatprep.subr.bf16.mxu0 %v2378_v56 }
 0x1ff   :  { %1944 = vmatpush3.bf16.msra.mxu0 %v2251_v53 }
 0x2b5   :  { %v1914_v54 = vpop.f32.mrb[4].mxu0 }
 0x2b6   :  { %v1915_v57 = vpop.f32.mrb[5].mxu0 }
 0x2b7   :  { %v1916_v58 = vadd.f32 %v1915_v57, %v1914_v54  ;;  %v1917_v59 = vpop.f32.mrb[6].mxu0 }
 0x2b8   :  { %v1918_v60 = vpop.f32.mrb[7].mxu0 }
 0x2b9   :  { %v1549_v61 = vadd.f32 %v1916_v58, %v1872_v55  ;;  %v1919_v62 = vadd.f32 %v1918_v60, %v1917_v59 }
 0x2bb   :  { %v1552_v63 = vadd.f32 %v1919_v62, %v1872_v55  ;;  %v1555_v0 = vmax.f32 %v1549_v61, 0.0 }
 0x2bd   :  { %v1556_v1 = vmax.f32 %v1552_v63, 0.0 }
 0x2bf   :  { %v1557_v2 = vpack.c.bf16 %v1556_v1, %v1555_v0 }
 0x2c1   :  { %1946 = vmatmul.mubr.bf16.vlgmr.msra.gmra.mrb[8].mxu0 %v1557_v2 }
 0x2c2   :  { %2329 = shalt.err (!%p2326_p0)
}
 0x2c3   :  { %s2330_s16 = scalar_lea.hbm %s2529_s5, 512 }
 0x2c4   :  { %p2331_p1 = scmp.ne.s32.totalorder %s2529_s5, %s2330_s16  ;;  %p2334_p2 = scmp.lt.u32.totalorder %s2330_s16, %s2529_s5 }
 0x2c6   :  { %p2336_p3 = pnand %p2334_p2, %p2331_p1 }
 0x2c8   :  { %2339 = shalt.err (!%p2336_p3)
}
 0x2c9   :  { %s2381_s20 = smov 256   ;;  %s2382_s21 = smov 16   ;;  %v1889_v56 = vld [vmem:[%s2527_s3 + $0x5] ss:$0 sm:$0xff] }
 0x2ca   :  { %1694 = dma.vmem_to_hbm [thread:$0]  %s1689_s12, 512, %s2529_s5, [#allocation10], %s2381_s20, %s2381_s20, %s2382_s21  }
 0x2cb   :  { %s2383_s26 = smov [#allocation8]  }
 0x2cc   :  { %s1676_s27 = sshll.u32 %s2383_s26, 4  ;;  %s1677_s27 = int_to_ptr.vmem [resolvable:$true] %s1676_s27 }
 0x2cd   :  { %s2340_s29 = scalar_lea.vmem %s1677_s27, 256  ;;  %p2345_p5 = scmp.lt.s32.totalorder %s1677_s27, %s1677_s27 }
 0x2ce   :  { %p2341_p4 = scmp.ne.s32.totalorder %s1677_s27, %s2340_s29  ;;  %p2346_p6 = scmp.lt.s32.totalorder %s2340_s29, %s2340_s29 }
 0x2d0   :  { %p2347_p7 = por %p2346_p6, %p2345_p5 }
 0x2d2   :  { %p2348_p8 = pnand %p2347_p7, %p2341_p4 }
 0x394   :  { %v1662_v3 = vpop.f32.mrb[8].mxu0 }
 0x395   :  { %v1663_v4 = vadd.f32 %v1889_v56, %v1662_v3  ;;  %v1947_v5 = vpop.f32.mrb[9].mxu0 }
 0x396   :  { %v1665_v6 = vpop.f32.mrb[10].mxu0 }
 0x397   :  { %1669 = vst [vmem:[#allocation8] sm:$0xff] %v1663_v4  ;;  %v1666_v7 = vadd.f32 %v1889_v56, %v1665_v6  ;;  %v1948_v8 = vpop.f32.mrb[11].mxu0 }
 0x399   :  { %1670 = vst [vmem:[#allocation8 + $0x8] sm:$0xff] %v1666_v7 }
 0x39a   :  { %2351 = shalt.err (!%p2348_p8)
}
 0x39b   :  { %s2352_s30 = scalar_lea.hbm %s2528_s4, 256 }
 0x39c   :  { %p2353_p9 = scmp.ne.s32.totalorder %s2528_s4, %s2352_s30  ;;  %p2356_p10 = scmp.lt.u32.totalorder %s2352_s30, %s2528_s4 }
 0x39e   :  { %p2358_p11 = pnand %p2356_p10, %p2353_p9 }
 0x3a0   :  { %2361 = shalt.err (!%p2358_p11)
}
 0x3a1   :  { %1682 = dma.vmem_to_hbm [thread:$0]  %s1677_s27, 256, %s2528_s4, [#allocation4], %s2375_s0, %s2375_s0, %s2376_s28  }
 0x3a2   :  { %2366 = dma.done.wait [#allocation4], 256  }
 0x3a3   :  { %2367 = vsyncadd [#allocation4], 4294967040 }
 0x3a4   :  { %2368 = dma.done.wait [#allocation10], 512  }
 0x3a5   :  { %2369 = vsyncadd [#allocation10], 4294966784 }
 0x3a6   :  { %1701 = vsyncpa [#allocation3], 1 }
 0x3a7   :  { %1702 = vsyncpa [#allocation6], 1 }
 0x3a8   :  { %1703 = vsyncpa [#allocation4], 1 }
 0x3a9   :  { %1704 = vsyncpa [#allocation10], 1 }

</bundles_post_ra>
